<compile_context>
chip_gen: v6e
topology: v6e:2x2x1
jax: 0.10.0
libtpu: 0.0.40
codegen_flags: <defaults>
</compile_context>

<pallas_src>
import functools

import jax
import jax.numpy as jnp
from jax import lax
from jax.experimental import pallas as pl
from jax.experimental.pallas import tpu as pltpu


def _round_up(x, m):
    return ((x + m - 1) // m) * m


def _num_tensorcores_per_device():
    try:
        dev = jax.devices()[0]
        n = getattr(dev, "num_cores", None) or getattr(dev, "core_count", None)
        return int(n) if n else 1
    except Exception:
        return 1


def _physical_vmem_bytes():
    try:
        return int(pltpu.get_tpu_info().vmem_capacity_bytes)
    except Exception:
        return 64 * 1024 * 1024        # conservative (v7x-sized) fallback


def _pick_unroll(tc, cap):
    """Largest unroll factor <= cap that divides tc (keeps fori_loop happy)."""
    u = max(1, min(tc, cap))
    while u > 1 and tc % u != 0:
        u -= 1
    return u


def _sompolinsky_kernel(u_ref, wrec_ref, out_ref, hid_ref, *, tc, unroll):
    """One grid step == `tc` recurrent Euler steps for one batch block.

    u_ref    : (tc, B_blk, H_pad)  u_dtype  precomputed dt*(x@Win + brec)
    wrec_ref : (H_pad, H_pad)      w_dtype  dt-prescaled recurrent weights
    out_ref  : (B_blk, H_pad)      f32      final hidden state
    hid_ref  : (B_blk, H_pad)      f32      hidden-state carry (VMEM scratch)
    """
    c = pl.program_id(1)   # time-chunk axis (innermost, "arbitrary")

    @pl.when(c == 0)
    def _init():
        hid_ref[...] = jnp.zeros_like(hid_ref)

    def step(i, hid):
        # Firing rate on the EUP (f32) -> MXU operand dtype.
        rate = jnp.tanh(hid).astype(wrec_ref.dtype)
        # Keep the RHS VMEM-sourced inside the loop (no hoisted materialization
        # of a large Wrec value; avoids vreg spills at big H_pad).
        # TODO(synk): when B_blk << H_pad, stage Wrec once per chunk with
        # pltpu.matmul_push_rhs / matmul_acc_lhs / matmul_pop so the RHS is not
        # re-streamed through the MXU every step (dominant cost at small batch).
        rec = jnp.dot(rate, wrec_ref[...], preferred_element_type=jnp.float32)
        return hid + rec + u_ref[i].astype(jnp.float32)

    hid = lax.fori_loop(0, tc, step, hid_ref[...], unroll=unroll)
    hid_ref[...] = hid
    out_ref[...] = hid      # output block is resident across the c axis


def sompolinsky_rnn_forward(inputs_btn, Win, Wrec, Wout, brec, bout, dt=0.01,
                            time_chunk=None, batch_block=None,
                            mxu_dtype=jnp.bfloat16, u_dtype=jnp.bfloat16):
    """inputs_btn: (B, T, N_in), batch-first like the PyTorch module.
    Returns (B, N_out) float32 == hid_T @ Wout + bout."""
    B, T, N_in = inputs_btn.shape
    H = Wrec.shape[0]

    # ---- TPU-native padding -------------------------------------------------
    H_pad = _round_up(H, 128)                          # lane multiple

    # Batch blocking: only split across batch when there are >=2 TensorCores;
    # on a 1-TC chip splitting would double the number of serial steps.
    n_tc = _num_tensorcores_per_device()
    if batch_block is not None:
        B_blk = _round_up(max(1, int(batch_block)), 8)
        B_pad = _round_up(max(B, B_blk), B_blk)
    elif n_tc >= 2 and B >= 16:
        B_pad = _round_up(B, 16)
        B_blk = B_pad // 2
    else:
        B_pad = _round_up(B, 8)
        B_blk = B_pad
    n_bblk = B_pad // B_blk

    u_bytes = jnp.dtype(u_dtype).itemsize
    w_bytes = jnp.dtype(mxu_dtype).itemsize

    vmem_cap = _physical_vmem_bytes()
    budget = int(vmem_cap * 0.8)                       # headroom for compiler scratch

    # Tc-independent resident bytes: Wrec (single-buffered), output block
    # (double-buffered by the pipeline), hid carry scratch.  All shapes are
    # (8,128)-aligned, so this estimate is exact (no hidden tile padding).
    fixed_bytes = (H_pad * H_pad * w_bytes
                   + 2 * B_blk * H_pad * 4
                   + B_blk * H_pad * 4)

    # Time chunk: large enough to amortize the ~0.35us per-grid-step overhead,
    # shrunk to fit the per-generation VMEM budget (U chunk is double-buffered).
    if time_chunk is None:
        time_chunk = 256
    Tc = max(1, min(int(time_chunk), T))
    while Tc > 1 and fixed_bytes + 2 * Tc * B_blk * H_pad * u_bytes > budget:
        Tc //= 2
    T_pad = _round_up(T, Tc)
    n_chunks = T_pad // Tc

    # ---- hoisted input projection (one big XLA matmul) ----------------------
    # U[t] = dt * (x_t @ Win + brec).  Time padding goes at the FRONT: with
    # hid_0 == 0 and tanh(0) == 0, zero-U steps keep hid exactly 0, so padded
    # steps are exact no-ops -> no per-step masking in the kernel.
    x_f32 = inputs_btn.astype(jnp.float32)
    u = dt * (jnp.einsum("btn,nh->bth", x_f32, Win.astype(jnp.float32))
              + brec.astype(jnp.float32))              # (B, T, H) f32
    u = jnp.transpose(u, (1, 0, 2))                    # (T, B, H) time-major
    u = jnp.pad(u, ((T_pad - T, 0), (0, B_pad - B), (0, H_pad - H)))
    u = u.astype(u_dtype)                              # (T_pad, B_pad, H_pad)

    # dt-prescaled, zero-padded recurrent weights.  Zero padding is exact:
    # padded hidden units stay 0 and never leak into real columns.
    wrec_p = jnp.pad(Wrec.astype(jnp.float32) * dt,
                     ((0, H_pad - H), (0, H_pad - H))).astype(mxu_dtype)

    # ---- compiler params ----------------------------------------------------
    needed = fixed_bytes + 2 * Tc * B_blk * H_pad * u_bytes
    compiler_kwargs = dict(dimension_semantics=("parallel", "arbitrary"))
    if needed > 12 * 1024 * 1024:                      # below every gen's default
        compiler_kwargs["vmem_limit_bytes"] = min(int(needed * 1.3) + (1 << 20),
                                                  budget)

    # Bound the unrolled live range when the hidden-state block is large
    # (avoid the vreg-spill regime); small states get a deeper unroll.
    unroll_cap = 32 if B_blk * H_pad * 4 <= 8 * 4096 else 8
    unroll = _pick_unroll(Tc, unroll_cap)

    kernel = functools.partial(_sompolinsky_kernel, tc=Tc, unroll=unroll)

    def _run(single_buffer_weights):
        if single_buffer_weights:
            wrec_spec = pl.BlockSpec((H_pad, H_pad), lambda b, c: (0, 0),
                                     pipeline_mode=pl.Buffered(1))
        else:
            wrec_spec = pl.BlockSpec((H_pad, H_pad), lambda b, c: (0, 0))
        return pl.pallas_call(
            kernel,
            out_shape=jax.ShapeDtypeStruct((B_pad, H_pad), jnp.float32),
            grid_spec=pltpu.PrefetchScalarGridSpec(
                num_scalar_prefetch=0,
                grid=(n_bblk, n_chunks),
                in_specs=[
                    pl.BlockSpec((Tc, B_blk, H_pad), lambda b, c: (c, b, 0)),  # U
                    wrec_spec,                                                 # dt*Wrec
                ],
                out_specs=pl.BlockSpec((B_blk, H_pad), lambda b, c: (b, 0)),
                scratch_shapes=[pltpu.VMEM((B_blk, H_pad), jnp.float32)],      # carry
            ),
            compiler_params=pltpu.CompilerParams(**compiler_kwargs),
        )(u, wrec_p)

    try:
        hid_final = _run(True)    # Wrec single-buffered (constant index map)
    except Exception:
        hid_final = _run(False)   # fall back if pipeline_mode=Buffered(1) rejected

    # Final readout (Wout/bout used exactly once) -> plain XLA matmul, full f32.
    hid = hid_final[:B, :H]
    return hid @ Wout.astype(jnp.float32) + bout.astype(jnp.float32)


def _reference_forward(inputs_btn, Win, Wrec, Wout, brec, bout, dt=0.01):
    """Pure-JAX f32 reference mirroring the PyTorch loop."""
    B, T, _ = inputs_btn.shape
    hid = jnp.zeros((Wrec.shape[0],), jnp.float32)   # 1-D init, broadcasts like torch
    for t in range(T):
        hid = hid + dt * (jnp.tanh(hid) @ Wrec + inputs_btn[:, t] @ Win + brec)
    return hid @ Wout + bout


if __name__ == "__main__":
    key = jax.random.PRNGKey(0)
    keys = jax.random.split(key, 12)

    # ---- test 1: small shapes, default bf16 MXU path ------------------------
    B, T, N_in, H, N_out = 2, 8, 4, 32, 4
    dt = 0.01
    inputs = jax.random.normal(keys[0], (B, T, N_in), dtype=jnp.float32)
    Win = jax.random.normal(keys[1], (N_in, H), dtype=jnp.float32) / jnp.sqrt(N_in)
    Wrec = 1.5 * jax.random.normal(keys[2], (H, H), dtype=jnp.float32) / jnp.sqrt(H)
    Wout = jax.random.normal(keys[3], (H, N_out), dtype=jnp.float32) / jnp.sqrt(H)
    brec = 0.1 * jax.random.normal(keys[4], (H,), dtype=jnp.float32)
    bout = 0.1 * jax.random.normal(keys[5], (N_out,), dtype=jnp.float32)

    out = sompolinsky_rnn_forward(inputs, Win, Wrec, Wout, brec, bout, dt=dt)
    out = jax.block_until_ready(out)
    ref = _reference_forward(inputs, Win, Wrec, Wout, brec, bout, dt=dt)
    assert out.shape == (B, N_out)
    assert jnp.allclose(out, ref, atol=1e-2, rtol=1e-2), (out, ref)

    # ---- test 2: ragged T (front zero-padding), padded H, f32-weights path ---
    B2, T2, N_in2, H2, N_out2 = 3, 25, 5, 96, 3
    inputs2 = jax.random.normal(keys[6], (B2, T2, N_in2), dtype=jnp.float32)
    Win2 = jax.random.normal(keys[7], (N_in2, H2), dtype=jnp.float32) / jnp.sqrt(N_in2)
    Wrec2 = 1.5 * jax.random.normal(keys[8], (H2, H2), dtype=jnp.float32) / jnp.sqrt(H2)
    Wout2 = jax.random.normal(keys[9], (H2, N_out2), dtype=jnp.float32) / jnp.sqrt(H2)
    brec2 = 0.1 * jax.random.normal(keys[10], (H2,), dtype=jnp.float32)
    bout2 = 0.1 * jax.random.normal(keys[11], (N_out2,), dtype=jnp.float32)

    out2 = sompolinsky_rnn_forward(inputs2, Win2, Wrec2, Wout2, brec2, bout2, dt=dt,
                                   time_chunk=8,
                                   mxu_dtype=jnp.float32, u_dtype=jnp.float32)
    out2 = jax.block_until_ready(out2)
    ref2 = _reference_forward(inputs2, Win2, Wrec2, Wout2, brec2, bout2, dt=dt)
    assert out2.shape == (B2, N_out2)
    assert jnp.allclose(out2, ref2, atol=1e-2, rtol=1e-2), (out2, ref2)

    print("KERNEL_OK")
</pallas_src>

<mosaic_0001>
module attributes {stable_mosaic.version = 11 : i64} {
  func.func @_sompolinsky_kernel(%arg0: i32, %arg1: i32, %arg2: memref<8x8x128xbf16, #tpu.memory_space<vmem>>, %arg3: memref<128x128xbf16, #tpu.memory_space<vmem>>, %arg4: memref<8x128xf32, #tpu.memory_space<vmem>>, %arg5: memref<8x128xf32, #tpu.memory_space<vmem>>) attributes {dimension_semantics = [#tpu.dimension_semantics<parallel>, #tpu.dimension_semantics<arbitrary>], iteration_bounds = array<i64: 1, 1>, scalar_prefetch = 0 : i64, scratch_operands = 1 : i64, tpu.core_type = #tpu.core_type<tc>, window_params = [{transform_indices = @transform_0, window_bounds = array<i64: 8, 8, 128>}, {pipeline_mode = #tpu.pipeline_mode<synchronous>, transform_indices = @transform_1, window_bounds = array<i64: 128, 128>}, {transform_indices = @transform_2, window_bounds = array<i64: 8, 128>}]} {
    %c0_i32 = arith.constant 0 : i32
    %0 = arith.cmpi eq, %arg1, %c0_i32 : i32
    %1 = arith.extui %0 : i1 to i32
    %c0_i32_0 = arith.constant 0 : i32
    %2 = arith.cmpi ne, %1, %c0_i32_0 : i32
    scf.if %2 {
      %cst_46 = arith.constant 0.000000e+00 : f32
      %86 = vector.broadcast %cst_46 : f32 to vector<8x128xf32>
      %c0_47 = arith.constant 0 : index
      %c0_48 = arith.constant 0 : index
      %87 = vector.load %arg5[%c0_47, %c0_48] : memref<8x128xf32, #tpu.memory_space<vmem>>, vector<8x128xf32>
      tpu.vector_store %arg5[%c0_47, %c0_48], %86 {strides = array<i32>} : memref<8x128xf32, #tpu.memory_space<vmem>>, vector<8x128xf32>,
    } else {
    }
    %c0 = arith.constant 0 : index
    %c0_1 = arith.constant 0 : index
    %3 = vector.load %arg5[%c0, %c0_1] : memref<8x128xf32, #tpu.memory_space<vmem>>, vector<8x128xf32>
    %c0_i32_2 = arith.constant 0 : i32
    %4 = math.tanh %3 : vector<8x128xf32>
    %5 = arith.truncf %4 : vector<8x128xf32> to vector<8x128xbf16>
    %c0_3 = arith.constant 0 : index
    %c0_4 = arith.constant 0 : index
    %6 = vector.load %arg3[%c0_3, %c0_4] : memref<128x128xbf16, #tpu.memory_space<vmem>>, vector<128x128xbf16>
    %cst = arith.constant dense<0.000000e+00> : vector<8x128xf32>
    %7 = tpu.matmul %5, %6, %cst {dimension_numbers = #tpu.dot_dimension_numbers<[1], [0], [0], [1], [0, 0, 1, 1], [], []>} : vector<8x128xbf16>, vector<128x128xbf16>, vector<8x128xf32> -> vector<8x128xf32>
    %8 = arith.addf %3, %7 : vector<8x128xf32>
    %9 = arith.index_cast %c0_i32_2 : i32 to index
    %c0_5 = arith.constant 0 : index
    %c0_6 = arith.constant 0 : index
    %10 = vector.load %arg2[%9, %c0_5, %c0_6] : memref<8x8x128xbf16, #tpu.memory_space<vmem>>, vector<1x8x128xbf16>
    %11 = vector.shape_cast %10 : vector<1x8x128xbf16> to vector<8x128xbf16>
    %12 = arith.extf %11 : vector<8x128xbf16> to vector<8x128xf32>
    %13 = arith.addf %8, %12 : vector<8x128xf32>
    %c1_i32 = arith.constant 1 : i32
    %14 = math.tanh %13 : vector<8x128xf32>
    %15 = arith.truncf %14 : vector<8x128xf32> to vector<8x128xbf16>
    %c0_7 = arith.constant 0 : index
    %c0_8 = arith.constant 0 : index
    %16 = vector.load %arg3[%c0_7, %c0_8] : memref<128x128xbf16, #tpu.memory_space<vmem>>, vector<128x128xbf16>
    %cst_9 = arith.constant dense<0.000000e+00> : vector<8x128xf32>
    %17 = tpu.matmul %15, %16, %cst_9 {dimension_numbers = #tpu.dot_dimension_numbers<[1], [0], [0], [1], [0, 0, 1, 1], [], []>} : vector<8x128xbf16>, vector<128x128xbf16>, vector<8x128xf32> -> vector<8x128xf32>
    %18 = arith.addf %13, %17 : vector<8x128xf32>
    %19 = arith.index_cast %c1_i32 : i32 to index
    %c0_10 = arith.constant 0 : index
    %c0_11 = arith.constant 0 : index
    %20 = vector.load %arg2[%19, %c0_10, %c0_11] : memref<8x8x128xbf16, #tpu.memory_space<vmem>>, vector<1x8x128xbf16>
    %21 = vector.shape_cast %20 : vector<1x8x128xbf16> to vector<8x128xbf16>
    %22 = arith.extf %21 : vector<8x128xbf16> to vector<8x128xf32>
    %23 = arith.addf %18, %22 : vector<8x128xf32>
    %c2_i32 = arith.constant 2 : i32
    %24 = math.tanh %23 : vector<8x128xf32>
    %25 = arith.truncf %24 : vector<8x128xf32> to vector<8x128xbf16>
    %c0_12 = arith.constant 0 : index
    %c0_13 = arith.constant 0 : index
    %26 = vector.load %arg3[%c0_12, %c0_13] : memref<128x128xbf16, #tpu.memory_space<vmem>>, vector<128x128xbf16>
    %cst_14 = arith.constant dense<0.000000e+00> : vector<8x128xf32>
    %27 = tpu.matmul %25, %26, %cst_14 {dimension_numbers = #tpu.dot_dimension_numbers<[1], [0], [0], [1], [0, 0, 1, 1], [], []>} : vector<8x128xbf16>, vector<128x128xbf16>, vector<8x128xf32> -> vector<8x128xf32>
    %28 = arith.addf %23, %27 : vector<8x128xf32>
    %29 = arith.index_cast %c2_i32 : i32 to index
    %c0_15 = arith.constant 0 : index
    %c0_16 = arith.constant 0 : index
    %30 = vector.load %arg2[%29, %c0_15, %c0_16] : memref<8x8x128xbf16, #tpu.memory_space<vmem>>, vector<1x8x128xbf16>
    %31 = vector.shape_cast %30 : vector<1x8x128xbf16> to vector<8x128xbf16>
    %32 = arith.extf %31 : vector<8x128xbf16> to vector<8x128xf32>
    %33 = arith.addf %28, %32 : vector<8x128xf32>
    %c3_i32 = arith.constant 3 : i32
    %34 = math.tanh %33 : vector<8x128xf32>
    %35 = arith.truncf %34 : vector<8x128xf32> to vector<8x128xbf16>
    %c0_17 = arith.constant 0 : index
    %c0_18 = arith.constant 0 : index
    %36 = vector.load %arg3[%c0_17, %c0_18] : memref<128x128xbf16, #tpu.memory_space<vmem>>, vector<128x128xbf16>
    %cst_19 = arith.constant dense<0.000000e+00> : vector<8x128xf32>
    %37 = tpu.matmul %35, %36, %cst_19 {dimension_numbers = #tpu.dot_dimension_numbers<[1], [0], [0], [1], [0, 0, 1, 1], [], []>} : vector<8x128xbf16>, vector<128x128xbf16>, vector<8x128xf32> -> vector<8x128xf32>
    %38 = arith.addf %33, %37 : vector<8x128xf32>
    %39 = arith.index_cast %c3_i32 : i32 to index
    %c0_20 = arith.constant 0 : index
    %c0_21 = arith.constant 0 : index
    %40 = vector.load %arg2[%39, %c0_20, %c0_21] : memref<8x8x128xbf16, #tpu.memory_space<vmem>>, vector<1x8x128xbf16>
    %41 = vector.shape_cast %40 : vector<1x8x128xbf16> to vector<8x128xbf16>
    %42 = arith.extf %41 : vector<8x128xbf16> to vector<8x128xf32>
    %43 = arith.addf %38, %42 : vector<8x128xf32>
    %c4_i32 = arith.constant 4 : i32
    %44 = math.tanh %43 : vector<8x128xf32>
    %45 = arith.truncf %44 : vector<8x128xf32> to vector<8x128xbf16>
    %c0_22 = arith.constant 0 : index
    %c0_23 = arith.constant 0 : index
    %46 = vector.load %arg3[%c0_22, %c0_23] : memref<128x128xbf16, #tpu.memory_space<vmem>>, vector<128x128xbf16>
    %cst_24 = arith.constant dense<0.000000e+00> : vector<8x128xf32>
    %47 = tpu.matmul %45, %46, %cst_24 {dimension_numbers = #tpu.dot_dimension_numbers<[1], [0], [0], [1], [0, 0, 1, 1], [], []>} : vector<8x128xbf16>, vector<128x128xbf16>, vector<8x128xf32> -> vector<8x128xf32>
    %48 = arith.addf %43, %47 : vector<8x128xf32>
    %49 = arith.index_cast %c4_i32 : i32 to index
    %c0_25 = arith.constant 0 : index
    %c0_26 = arith.constant 0 : index
    %50 = vector.load %arg2[%49, %c0_25, %c0_26] : memref<8x8x128xbf16, #tpu.memory_space<vmem>>, vector<1x8x128xbf16>
    %51 = vector.shape_cast %50 : vector<1x8x128xbf16> to vector<8x128xbf16>
    %52 = arith.extf %51 : vector<8x128xbf16> to vector<8x128xf32>
    %53 = arith.addf %48, %52 : vector<8x128xf32>
    %c5_i32 = arith.constant 5 : i32
    %54 = math.tanh %53 : vector<8x128xf32>
    %55 = arith.truncf %54 : vector<8x128xf32> to vector<8x128xbf16>
    %c0_27 = arith.constant 0 : index
    %c0_28 = arith.constant 0 : index
    %56 = vector.load %arg3[%c0_27, %c0_28] : memref<128x128xbf16, #tpu.memory_space<vmem>>, vector<128x128xbf16>
    %cst_29 = arith.constant dense<0.000000e+00> : vector<8x128xf32>
    %57 = tpu.matmul %55, %56, %cst_29 {dimension_numbers = #tpu.dot_dimension_numbers<[1], [0], [0], [1], [0, 0, 1, 1], [], []>} : vector<8x128xbf16>, vector<128x128xbf16>, vector<8x128xf32> -> vector<8x128xf32>
    %58 = arith.addf %53, %57 : vector<8x128xf32>
    %59 = arith.index_cast %c5_i32 : i32 to index
    %c0_30 = arith.constant 0 : index
    %c0_31 = arith.constant 0 : index
    %60 = vector.load %arg2[%59, %c0_30, %c0_31] : memref<8x8x128xbf16, #tpu.memory_space<vmem>>, vector<1x8x128xbf16>
    %61 = vector.shape_cast %60 : vector<1x8x128xbf16> to vector<8x128xbf16>
    %62 = arith.extf %61 : vector<8x128xbf16> to vector<8x128xf32>
    %63 = arith.addf %58, %62 : vector<8x128xf32>
    %c6_i32 = arith.constant 6 : i32
    %64 = math.tanh %63 : vector<8x128xf32>
    %65 = arith.truncf %64 : vector<8x128xf32> to vector<8x128xbf16>
    %c0_32 = arith.constant 0 : index
    %c0_33 = arith.constant 0 : index
    %66 = vector.load %arg3[%c0_32, %c0_33] : memref<128x128xbf16, #tpu.memory_space<vmem>>, vector<128x128xbf16>
    %cst_34 = arith.constant dense<0.000000e+00> : vector<8x128xf32>
    %67 = tpu.matmul %65, %66, %cst_34 {dimension_numbers = #tpu.dot_dimension_numbers<[1], [0], [0], [1], [0, 0, 1, 1], [], []>} : vector<8x128xbf16>, vector<128x128xbf16>, vector<8x128xf32> -> vector<8x128xf32>
    %68 = arith.addf %63, %67 : vector<8x128xf32>
    %69 = arith.index_cast %c6_i32 : i32 to index
    %c0_35 = arith.constant 0 : index
    %c0_36 = arith.constant 0 : index
    %70 = vector.load %arg2[%69, %c0_35, %c0_36] : memref<8x8x128xbf16, #tpu.memory_space<vmem>>, vector<1x8x128xbf16>
    %71 = vector.shape_cast %70 : vector<1x8x128xbf16> to vector<8x128xbf16>
    %72 = arith.extf %71 : vector<8x128xbf16> to vector<8x128xf32>
    %73 = arith.addf %68, %72 : vector<8x128xf32>
    %c7_i32 = arith.constant 7 : i32
    %74 = math.tanh %73 : vector<8x128xf32>
    %75 = arith.truncf %74 : vector<8x128xf32> to vector<8x128xbf16>
    %c0_37 = arith.constant 0 : index
    %c0_38 = arith.constant 0 : index
    %76 = vector.load %arg3[%c0_37, %c0_38] : memref<128x128xbf16, #tpu.memory_space<vmem>>, vector<128x128xbf16>
    %cst_39 = arith.constant dense<0.000000e+00> : vector<8x128xf32>
    %77 = tpu.matmul %75, %76, %cst_39 {dimension_numbers = #tpu.dot_dimension_numbers<[1], [0], [0], [1], [0, 0, 1, 1], [], []>} : vector<8x128xbf16>, vector<128x128xbf16>, vector<8x128xf32> -> vector<8x128xf32>
    %78 = arith.addf %73, %77 : vector<8x128xf32>
    %79 = arith.index_cast %c7_i32 : i32 to index
    %c0_40 = arith.constant 0 : index
    %c0_41 = arith.constant 0 : index
    %80 = vector.load %arg2[%79, %c0_40, %c0_41] : memref<8x8x128xbf16, #tpu.memory_space<vmem>>, vector<1x8x128xbf16>
    %81 = vector.shape_cast %80 : vector<1x8x128xbf16> to vector<8x128xbf16>
    %82 = arith.extf %81 : vector<8x128xbf16> to vector<8x128xf32>
    %83 = arith.addf %78, %82 : vector<8x128xf32>
    %c8_i32 = arith.constant 8 : i32
    %c0_42 = arith.constant 0 : index
    %c0_43 = arith.constant 0 : index
    %84 = vector.load %arg5[%c0_42, %c0_43] : memref<8x128xf32, #tpu.memory_space<vmem>>, vector<8x128xf32>
    tpu.vector_store %arg5[%c0_42, %c0_43], %83 {strides = array<i32>} : memref<8x128xf32, #tpu.memory_space<vmem>>, vector<8x128xf32>,
    %c0_44 = arith.constant 0 : index
    %c0_45 = arith.constant 0 : index
    %85 = vector.load %arg4[%c0_44, %c0_45] : memref<8x128xf32, #tpu.memory_space<vmem>>, vector<8x128xf32>
    tpu.vector_store %arg4[%c0_44, %c0_45], %83 {strides = array<i32>} : memref<8x128xf32, #tpu.memory_space<vmem>>, vector<8x128xf32>,
    return
  }
  func.func @transform_0(%arg0: i32, %arg1: i32) -> (i32, i32, i32) {
    %c0_i32 = arith.constant 0 : i32
    %c0_i32_0 = arith.constant 0 : i32
    return %arg1, %arg0, %c0_i32 : i32, i32, i32
  }
  func.func @transform_1(%arg0: i32, %arg1: i32) -> (i32, i32) {
    %c0_i32 = arith.constant 0 : i32
    %c0_i32_0 = arith.constant 0 : i32
    %c0_i32_1 = arith.constant 0 : i32
    return %c0_i32, %c0_i32_0 : i32, i32
  }
  func.func @transform_2(%arg0: i32, %arg1: i32) -> (i32, i32) {
    %c0_i32 = arith.constant 0 : i32
    %c0_i32_0 = arith.constant 0 : i32
    return %arg0, %c0_i32 : i32, i32
  }
}

module attributes {stable_mosaic.version = 11 : i64} {
  func.func @_sompolinsky_kernel(%arg0: i32, %arg1: i32, %arg2: memref<8x8x128xbf16, #tpu.memory_space<vmem>>, %arg3: memref<128x128xbf16, #tpu.memory_space<vmem>>, %arg4: memref<8x128xf32, #tpu.memory_space<vmem>>, %arg5: memref<8x128xf32, #tpu.memory_space<vmem>>) attributes {dimension_semantics = [#tpu.dimension_semantics<parallel>, #tpu.dimension_semantics<arbitrary>], iteration_bounds = array<i64: 1, 1>, scalar_prefetch = 0 : i64, scratch_operands = 1 : i64, tpu.core_type = #tpu.core_type<tc>, window_params = [{transform_indices = @transform_0, window_bounds = array<i64: 8, 8, 128>}, {pipeline_mode = #tpu.pipeline_mode<synchronous>, transform_indices = @transform_1, window_bounds = array<i64: 128, 128>}, {transform_indices = @transform_2, window_bounds = array<i64: 8, 128>}]} {
    %c0_i32 = arith.constant 0 : i32
    %0 = arith.cmpi eq, %arg1, %c0_i32 : i32
    %1 = arith.extui %0 : i1 to i32
    %c0_i32_0 = arith.constant 0 : i32
    %2 = arith.cmpi ne, %1, %c0_i32_0 : i32
    scf.if %2 {
      %cst_46 = arith.constant 0.000000e+00 : f32
      %86 = vector.broadcast %cst_46 : f32 to vector<8x128xf32>
      %c0_47 = arith.constant 0 : index
      %c0_48 = arith.constant 0 : index
      %87 = vector.load %arg5[%c0_47, %c0_48] : memref<8x128xf32, #tpu.memory_space<vmem>>, vector<8x128xf32>
      tpu.vector_store %arg5[%c0_47, %c0_48], %86 {strides = array<i32>} : memref<8x128xf32, #tpu.memory_space<vmem>>, vector<8x128xf32>,
    } else {
    }
    %c0 = arith.constant 0 : index
    %c0_1 = arith.constant 0 : index
    %3 = vector.load %arg5[%c0, %c0_1] : memref<8x128xf32, #tpu.memory_space<vmem>>, vector<8x128xf32>
    %c0_i32_2 = arith.constant 0 : i32
    %4 = math.tanh %3 : vector<8x128xf32>
    %5 = arith.truncf %4 : vector<8x128xf32> to vector<8x128xbf16>
    %c0_3 = arith.constant 0 : index
    %c0_4 = arith.constant 0 : index
    %6 = vector.load %arg3[%c0_3, %c0_4] : memref<128x128xbf16, #tpu.memory_space<vmem>>, vector<128x128xbf16>
    %cst = arith.constant dense<0.000000e+00> : vector<8x128xf32>
    %7 = tpu.matmul %5, %6, %cst {dimension_numbers = #tpu.dot_dimension_numbers<[1], [0], [0], [1], [0, 0, 1, 1], [], []>} : vector<8x128xbf16>, vector<128x128xbf16>, vector<8x128xf32> -> vector<8x128xf32>
    %8 = arith.addf %3, %7 : vector<8x128xf32>
    %9 = arith.index_cast %c0_i32_2 : i32 to index
    %c0_5 = arith.constant 0 : index
    %c0_6 = arith.constant 0 : index
    %10 = vector.load %arg2[%9, %c0_5, %c0_6] : memref<8x8x128xbf16, #tpu.memory_space<vmem>>, vector<1x8x128xbf16>
    %11 = vector.shape_cast %10 : vector<1x8x128xbf16> to vector<8x128xbf16>
    %12 = arith.extf %11 : vector<8x128xbf16> to vector<8x128xf32>
    %13 = arith.addf %8, %12 : vector<8x128xf32>
    %c1_i32 = arith.constant 1 : i32
    %14 = math.tanh %13 : vector<8x128xf32>
    %15 = arith.truncf %14 : vector<8x128xf32> to vector<8x128xbf16>
    %c0_7 = arith.constant 0 : index
    %c0_8 = arith.constant 0 : index
    %16 = vector.load %arg3[%c0_7, %c0_8] : memref<128x128xbf16, #tpu.memory_space<vmem>>, vector<128x128xbf16>
    %cst_9 = arith.constant dense<0.000000e+00> : vector<8x128xf32>
    %17 = tpu.matmul %15, %16, %cst_9 {dimension_numbers = #tpu.dot_dimension_numbers<[1], [0], [0], [1], [0, 0, 1, 1], [], []>} : vector<8x128xbf16>, vector<128x128xbf16>, vector<8x128xf32> -> vector<8x128xf32>
    %18 = arith.addf %13, %17 : vector<8x128xf32>
    %19 = arith.index_cast %c1_i32 : i32 to index
    %c0_10 = arith.constant 0 : index
    %c0_11 = arith.constant 0 : index
    %20 = vector.load %arg2[%19, %c0_10, %c0_11] : memref<8x8x128xbf16, #tpu.memory_space<vmem>>, vector<1x8x128xbf16>
    %21 = vector.shape_cast %20 : vector<1x8x128xbf16> to vector<8x128xbf16>
    %22 = arith.extf %21 : vector<8x128xbf16> to vector<8x128xf32>
    %23 = arith.addf %18, %22 : vector<8x128xf32>
    %c2_i32 = arith.constant 2 : i32
    %24 = math.tanh %23 : vector<8x128xf32>
    %25 = arith.truncf %24 : vector<8x128xf32> to vector<8x128xbf16>
    %c0_12 = arith.constant 0 : index
    %c0_13 = arith.constant 0 : index
    %26 = vector.load %arg3[%c0_12, %c0_13] : memref<128x128xbf16, #tpu.memory_space<vmem>>, vector<128x128xbf16>
    %cst_14 = arith.constant dense<0.000000e+00> : vector<8x128xf32>
    %27 = tpu.matmul %25, %26, %cst_14 {dimension_numbers = #tpu.dot_dimension_numbers<[1], [0], [0], [1], [0, 0, 1, 1], [], []>} : vector<8x128xbf16>, vector<128x128xbf16>, vector<8x128xf32> -> vector<8x128xf32>
    %28 = arith.addf %23, %27 : vector<8x128xf32>
    %29 = arith.index_cast %c2_i32 : i32 to index
    %c0_15 = arith.constant 0 : index
    %c0_16 = arith.constant 0 : index
    %30 = vector.load %arg2[%29, %c0_15, %c0_16] : memref<8x8x128xbf16, #tpu.memory_space<vmem>>, vector<1x8x128xbf16>
    %31 = vector.shape_cast %30 : vector<1x8x128xbf16> to vector<8x128xbf16>
    %32 = arith.extf %31 : vector<8x128xbf16> to vector<8x128xf32>
    %33 = arith.addf %28, %32 : vector<8x128xf32>
    %c3_i32 = arith.constant 3 : i32
    %34 = math.tanh %33 : vector<8x128xf32>
    %35 = arith.truncf %34 : vector<8x128xf32> to vector<8x128xbf16>
    %c0_17 = arith.constant 0 : index
    %c0_18 = arith.constant 0 : index
    %36 = vector.load %arg3[%c0_17, %c0_18] : memref<128x128xbf16, #tpu.memory_space<vmem>>, vector<128x128xbf16>
    %cst_19 = arith.constant dense<0.000000e+00> : vector<8x128xf32>
    %37 = tpu.matmul %35, %36, %cst_19 {dimension_numbers = #tpu.dot_dimension_numbers<[1], [0], [0], [1], [0, 0, 1, 1], [], []>} : vector<8x128xbf16>, vector<128x128xbf16>, vector<8x128xf32> -> vector<8x128xf32>
    %38 = arith.addf %33, %37 : vector<8x128xf32>
    %39 = arith.index_cast %c3_i32 : i32 to index
    %c0_20 = arith.constant 0 : index
    %c0_21 = arith.constant 0 : index
    %40 = vector.load %arg2[%39, %c0_20, %c0_21] : memref<8x8x128xbf16, #tpu.memory_space<vmem>>, vector<1x8x128xbf16>
    %41 = vector.shape_cast %40 : vector<1x8x128xbf16> to vector<8x128xbf16>
    %42 = arith.extf %41 : vector<8x128xbf16> to vector<8x128xf32>
    %43 = arith.addf %38, %42 : vector<8x128xf32>
    %c4_i32 = arith.constant 4 : i32
    %44 = math.tanh %43 : vector<8x128xf32>
    %45 = arith.truncf %44 : vector<8x128xf32> to vector<8x128xbf16>
    %c0_22 = arith.constant 0 : index
    %c0_23 = arith.constant 0 : index
    %46 = vector.load %arg3[%c0_22, %c0_23] : memref<128x128xbf16, #tpu.memory_space<vmem>>, vector<128x128xbf16>
    %cst_24 = arith.constant dense<0.000000e+00> : vector<8x128xf32>
    %47 = tpu.matmul %45, %46, %cst_24 {dimension_numbers = #tpu.dot_dimension_numbers<[1], [0], [0], [1], [0, 0, 1, 1], [], []>} : vector<8x128xbf16>, vector<128x128xbf16>, vector<8x128xf32> -> vector<8x128xf32>
    %48 = arith.addf %43, %47 : vector<8x128xf32>
    %49 = arith.index_cast %c4_i32 : i32 to index
    %c0_25 = arith.constant 0 : index
    %c0_26 = arith.constant 0 : index
    %50 = vector.load %arg2[%49, %c0_25, %c0_26] : memref<8x8x128xbf16, #tpu.memory_space<vmem>>, vector<1x8x128xbf16>
    %51 = vector.shape_cast %50 : vector<1x8x128xbf16> to vector<8x128xbf16>
    %52 = arith.extf %51 : vector<8x128xbf16> to vector<8x128xf32>
    %53 = arith.addf %48, %52 : vector<8x128xf32>
    %c5_i32 = arith.constant 5 : i32
    %54 = math.tanh %53 : vector<8x128xf32>
    %55 = arith.truncf %54 : vector<8x128xf32> to vector<8x128xbf16>
    %c0_27 = arith.constant 0 : index
    %c0_28 = arith.constant 0 : index
    %56 = vector.load %arg3[%c0_27, %c0_28] : memref<128x128xbf16, #tpu.memory_space<vmem>>, vector<128x128xbf16>
    %cst_29 = arith.constant dense<0.000000e+00> : vector<8x128xf32>
    %57 = tpu.matmul %55, %56, %cst_29 {dimension_numbers = #tpu.dot_dimension_numbers<[1], [0], [0], [1], [0, 0, 1, 1], [], []>} : vector<8x128xbf16>, vector<128x128xbf16>, vector<8x128xf32> -> vector<8x128xf32>
    %58 = arith.addf %53, %57 : vector<8x128xf32>
    %59 = arith.index_cast %c5_i32 : i32 to index
    %c0_30 = arith.constant 0 : index
    %c0_31 = arith.constant 0 : index
    %60 = vector.load %arg2[%59, %c0_30, %c0_31] : memref<8x8x128xbf16, #tpu.memory_space<vmem>>, vector<1x8x128xbf16>
    %61 = vector.shape_cast %60 : vector<1x8x128xbf16> to vector<8x128xbf16>
    %62 = arith.extf %61 : vector<8x128xbf16> to vector<8x128xf32>
    %63 = arith.addf %58, %62 : vector<8x128xf32>
    %c6_i32 = arith.constant 6 : i32
    %64 = math.tanh %63 : vector<8x128xf32>
    %65 = arith.truncf %64 : vector<8x128xf32> to vector<8x128xbf16>
    %c0_32 = arith.constant 0 : index
    %c0_33 = arith.constant 0 : index
    %66 = vector.load %arg3[%c0_32, %c0_33] : memref<128x128xbf16, #tpu.memory_space<vmem>>, vector<128x128xbf16>
    %cst_34 = arith.constant dense<0.000000e+00> : vector<8x128xf32>
    %67 = tpu.matmul %65, %66, %cst_34 {dimension_numbers = #tpu.dot_dimension_numbers<[1], [0], [0], [1], [0, 0, 1, 1], [], []>} : vector<8x128xbf16>, vector<128x128xbf16>, vector<8x128xf32> -> vector<8x128xf32>
    %68 = arith.addf %63, %67 : vector<8x128xf32>
    %69 = arith.index_cast %c6_i32 : i32 to index
    %c0_35 = arith.constant 0 : index
    %c0_36 = arith.constant 0 : index
    %70 = vector.load %arg2[%69, %c0_35, %c0_36] : memref<8x8x128xbf16, #tpu.memory_space<vmem>>, vector<1x8x128xbf16>
    %71 = vector.shape_cast %70 : vector<1x8x128xbf16> to vector<8x128xbf16>
    %72 = arith.extf %71 : vector<8x128xbf16> to vector<8x128xf32>
    %73 = arith.addf %68, %72 : vector<8x128xf32>
    %c7_i32 = arith.constant 7 : i32
    %74 = math.tanh %73 : vector<8x128xf32>
    %75 = arith.truncf %74 : vector<8x128xf32> to vector<8x128xbf16>
    %c0_37 = arith.constant 0 : index
    %c0_38 = arith.constant 0 : index
    %76 = vector.load %arg3[%c0_37, %c0_38] : memref<128x128xbf16, #tpu.memory_space<vmem>>, vector<128x128xbf16>
    %cst_39 = arith.constant dense<0.000000e+00> : vector<8x128xf32>
    %77 = tpu.matmul %75, %76, %cst_39 {dimension_numbers = #tpu.dot_dimension_numbers<[1], [0], [0], [1], [0, 0, 1, 1], [], []>} : vector<8x128xbf16>, vector<128x128xbf16>, vector<8x128xf32> -> vector<8x128xf32>
    %78 = arith.addf %73, %77 : vector<8x128xf32>
    %79 = arith.index_cast %c7_i32 : i32 to index
    %c0_40 = arith.constant 0 : index
    %c0_41 = arith.constant 0 : index
    %80 = vector.load %arg2[%79, %c0_40, %c0_41] : memref<8x8x128xbf16, #tpu.memory_space<vmem>>, vector<1x8x128xbf16>
    %81 = vector.shape_cast %80 : vector<1x8x128xbf16> to vector<8x128xbf16>
    %82 = arith.extf %81 : vector<8x128xbf16> to vector<8x128xf32>
    %83 = arith.addf %78, %82 : vector<8x128xf32>
    %c8_i32 = arith.constant 8 : i32
    %c0_42 = arith.constant 0 : index
    %c0_43 = arith.constant 0 : index
    %84 = vector.load %arg5[%c0_42, %c0_43] : memref<8x128xf32, #tpu.memory_space<vmem>>, vector<8x128xf32>
    tpu.vector_store %arg5[%c0_42, %c0_43], %83 {strides = array<i32>} : memref<8x128xf32, #tpu.memory_space<vmem>>, vector<8x128xf32>,
    %c0_44 = arith.constant 0 : index
    %c0_45 = arith.constant 0 : index
    %85 = vector.load %arg4[%c0_44, %c0_45] : memref<8x128xf32, #tpu.memory_space<vmem>>, vector<8x128xf32>
    tpu.vector_store %arg4[%c0_44, %c0_45], %83 {strides = array<i32>} : memref<8x128xf32, #tpu.memory_space<vmem>>, vector<8x128xf32>,
    return
  }
  func.func @transform_0(%arg0: i32, %arg1: i32) -> (i32, i32, i32) {
    %c0_i32 = arith.constant 0 : i32
    %c0_i32_0 = arith.constant 0 : i32
    return %arg1, %arg0, %c0_i32 : i32, i32, i32
  }
  func.func @transform_1(%arg0: i32, %arg1: i32) -> (i32, i32) {
    %c0_i32 = arith.constant 0 : i32
    %c0_i32_0 = arith.constant 0 : i32
    %c0_i32_1 = arith.constant 0 : i32
    return %c0_i32, %c0_i32_0 : i32, i32
  }
  func.func @transform_2(%arg0: i32, %arg1: i32) -> (i32, i32) {
    %c0_i32 = arith.constant 0 : i32
    %c0_i32_0 = arith.constant 0 : i32
    return %arg0, %c0_i32 : i32, i32
  }
}

</mosaic_0001>

<bundles_post_ra>
// kernel: tpu_custom_call.1
= control target key start
LH: loop header
LB: loop body
LE: loop exit
PB: predicated region body
PF: predicated region fallthrough
CT: control target
= control target key end

     0   :  { %7 = vsyncpa [#allocation4], 0  ;;  %s1032_s0 = inlined_call_operand.hbm [shape: bf16[8,8,128], index: 0, kind: input, shape index: {}]   ;;  %s1033_s1 = inlined_call_operand.hbm [shape: bf16[128,128], index: 1, kind: input, shape index: {}]   ;;  %s1034_s2 = inlined_call_operand.hbm [shape: f32[8,128], index: 2, kind: output, shape index: {}]  }
   0x1   :  { %8 = vsyncpa [#allocation7], 0 }
   0x2   :  { %9 = vsyncpa [#allocation5], 0  ;;  %s840_s9 = smov [#allocation3]  }
   0x3   :  { %s15_s10 = sshll.u32 %s840_s9, 4  ;;  %s16_s10 = int_to_ptr.vmem [resolvable:$true] %s15_s10 }
   0x4   :  { %s782_s11 = scalar_lea.vmem %s16_s10, 512  ;;  %p787_p1 = scmp.lt.s32.totalorder %s16_s10, %s16_s10 }
   0x5   :  { %p783_p0 = scmp.ne.s32.totalorder %s16_s10, %s782_s11  ;;  %p788_p2 = scmp.lt.s32.totalorder %s782_s11, %s782_s11 }
   0x7   :  { %p789_p3 = por %p788_p2, %p787_p1 }
   0x9   :  { %p790_p4 = pnand %p789_p3, %p783_p0 }
   0xb   :  { %793 = shalt.err (!%p790_p4)
}
   0xc   :  { %s841_s12 = smov 64   ;;  %s842_s13 = smov 4  }
   0xd   :  { %21 = dma.hbm_to_vmem [thread:$0]  %s1032_s0, 512, %s16_s10, [#allocation4], %s841_s12, %s841_s12, %s842_s13  }
   0xe   :  { %s843_s16 = smov [#allocation6]  }
   0xf   :  { %s27_s17 = sshll.u32 %s843_s16, 4  ;;  %s28_s17 = int_to_ptr.vmem [resolvable:$true] %s27_s17 }
  0x10   :  { %s802_s18 = scalar_lea.vmem %s28_s17, 1024  ;;  %p807_p6 = scmp.lt.s32.totalorder %s28_s17, %s28_s17 }
  0x11   :  { %p803_p5 = scmp.ne.s32.totalorder %s28_s17, %s802_s18  ;;  %p808_p7 = scmp.lt.s32.totalorder %s802_s18, %s802_s18 }
  0x13   :  { %p809_p8 = por %p808_p7, %p807_p6 }
  0x15   :  { %p810_p9 = pnand %p809_p8, %p803_p5 }
  0x17   :  { %813 = shalt.err (!%p810_p9)
}
  0x18   :  { %33 = dma.hbm_to_vmem [thread:$0]  %s1033_s1, 1024, %s28_s17, [#allocation7], %s841_s12, %s841_s12, %s842_s13  }
  0x19   :  { %834 = dma.done.wait [#allocation4], 512  }
  0x1a   :  { %835 = vsyncadd [#allocation4], 4294966784 }
  0x1b   :  { %836 = dma.done.wait [#allocation7], 1024  }
  0x1c   :  { %837 = vsyncadd [#allocation7], 4294966272  ;;  %v844_v0 = vmov 0.0   ;;  %vm845_vm0 = vmmov 0   ;;  %v875_v1 = vld [vmem:[#allocation6 + $0x38] sm:$0xff]   ;;  %v878_v2 = vld [vmem:[#allocation6 + $0x30] sm:$0xff]  }
  0x1d   :  { %584 = vmatprep.subr.bf16.mxu0 %v844_v0  ;;  %600 = vmatprep.mubr.msk.bf16.mxu0 %vm845_vm0, %v844_v0  ;;  %v884_v3 = vld [vmem:[#allocation6 + $0x28] sm:$0xff]   ;;  %v890_v4 = vld [vmem:[#allocation6 + $0x20] sm:$0xff]   ;;  %v896_v5 = vld [vmem:[#allocation6 + $0x18] sm:$0xff]   ;;  %v846_v9 = vmov 0.0|0.0   ;;  %s847_s0 = smov [#allocation8]  }
  0x1e   :  { %604 = vmatprep.subr.bf16.mxu1 %v844_v0  ;;  %620 = vmatprep.mubr.msk.bf16.mxu1 %vm845_vm0, %v844_v0  ;;  %v902_v6 = vld [vmem:[#allocation6 + $0x10] sm:$0xff]   ;;  %v908_v7 = vld [vmem:[#allocation6 + $0x8] sm:$0xff]   ;;  %v914_v8 = vld [vmem:[#allocation6] sm:$0xff]   ;;  %s494_s1 = sshll.u32 %s847_s0, 4  ;;  %s495_s1 = int_to_ptr.vmem [resolvable:$true] %s494_s1 }
  0x1f   :  { %585 = vmatpush3.bf16.msra.mxu0 %v875_v1  ;;  %605 = vmatpush3.bf16.msra.mxu1 %v875_v1  ;;  %v154_v10 = vld [vmem:[#allocation3] sm:$0xff]   ;;  %v248_v28 = vld [vmem:[#allocation3 + $0x8] sm:$0xff]   ;;  %v342_v47 = vld [vmem:[#allocation3 + $0x10] sm:$0xff]   ;;  %s814_s21 = scalar_lea.vmem %s495_s1, 128  ;;  %p819_p11 = scmp.lt.s32.totalorder %s495_s1, %s495_s1 }
  0x20   :  { %586 = vmatprep.subr.bf16.mxu0 %v844_v0  ;;  %606 = vmatprep.subr.bf16.mxu1 %v844_v0  ;;  %v155_v11 = vunpack.c.l.bf16 %v154_v10  ;;  %v202_v19 = vunpack.c.h.bf16 %v154_v10  ;;  %v249_v29 = vunpack.c.l.bf16 %v248_v28  ;;  %v296_v38 = vunpack.c.h.bf16 %v248_v28  ;;  %p815_p10 = scmp.ne.s32.totalorder %s495_s1, %s814_s21  ;;  %p820_p12 = scmp.lt.s32.totalorder %s814_s21, %s814_s21 }
  0x21   :  { %v343_v48 = vunpack.c.l.bf16 %v342_v47  ;;  %v390_v57 = vunpack.c.h.bf16 %v342_v47 }
  0x22   :  { %p821_p13 = por %p820_p12, %p819_p11 }
  0x23   :  { %587 = vmatpush3.bf16.msra.mxu0 %v878_v2  ;;  %607 = vmatpush3.bf16.msra.mxu1 %v878_v2 }
  0x24   :  { %588 = vmatprep.subr.bf16.mxu0 %v844_v0  ;;  %608 = vmatprep.subr.bf16.mxu1 %v844_v0  ;;  %p822_p0 = pnand %p821_p13, %p815_p10 }
  0x27   :  { %589 = vmatpush3.bf16.msra.mxu0 %v884_v3  ;;  %609 = vmatpush3.bf16.msra.mxu1 %v884_v3 }
  0x28   :  { %590 = vmatprep.subr.bf16.mxu0 %v844_v0  ;;  %610 = vmatprep.subr.bf16.mxu1 %v844_v0 }
  0x2b   :  { %591 = vmatpush3.bf16.msra.mxu0 %v890_v4  ;;  %611 = vmatpush3.bf16.msra.mxu1 %v890_v4 }
  0x2c   :  { %592 = vmatprep.subr.bf16.mxu0 %v844_v0  ;;  %612 = vmatprep.subr.bf16.mxu1 %v844_v0 }
  0x2f   :  { %593 = vmatpush3.bf16.msra.mxu0 %v896_v5  ;;  %613 = vmatpush3.bf16.msra.mxu1 %v896_v5 }
  0x30   :  { %594 = vmatprep.subr.bf16.mxu0 %v844_v0  ;;  %614 = vmatprep.subr.bf16.mxu1 %v844_v0 }
  0x33   :  { %595 = vmatpush3.bf16.msra.mxu0 %v902_v6  ;;  %615 = vmatpush3.bf16.msra.mxu1 %v902_v6 }
  0x34   :  { %596 = vmatprep.subr.bf16.mxu0 %v844_v0  ;;  %616 = vmatprep.subr.bf16.mxu1 %v844_v0 }
  0x37   :  { %597 = vmatpush3.bf16.msra.mxu0 %v908_v7  ;;  %617 = vmatpush3.bf16.msra.mxu1 %v908_v7 }
  0x38   :  { %598 = vmatprep.subr.bf16.mxu0 %v844_v0  ;;  %618 = vmatprep.subr.bf16.mxu1 %v844_v0 }
  0x3b   :  { %599 = vmatpush3.bf16.msra.mxu0 %v914_v8  ;;  %619 = vmatpush3.bf16.msra.mxu1 %v914_v8 }
  0x3c   :  { %624 = vmatprep.subr.bf16.mxu0 %v844_v0  ;;  %644 = vmatprep.subr.bf16.mxu1 %v844_v0 }
  0x3e   :  { %601 = vmatmul.mubr.bf16.vlgmr.msra.gmra.mxu0 %v846_v9 }
  0x3f   :  { %625 = vmatpush3.bf16.msra.mxu0 %v875_v1  ;;  %640 = vmatprep.mubr.msk.bf16.mxu0 %vm845_vm0, %v844_v0 }
  0x40   :  { %626 = vmatprep.subr.bf16.mxu0 %v844_v0 }
  0x43   :  { %627 = vmatpush3.bf16.msra.mxu0 %v878_v2 }
  0x44   :  { %628 = vmatprep.subr.bf16.mxu0 %v844_v0 }
  0x47   :  { %629 = vmatpush3.bf16.msra.mxu0 %v884_v3 }
  0x48   :  { %630 = vmatprep.subr.bf16.mxu0 %v844_v0 }
  0x4b   :  { %631 = vmatpush3.bf16.msra.mxu0 %v890_v4 }
  0x4c   :  { %632 = vmatprep.subr.bf16.mxu0 %v844_v0 }
  0x4f   :  { %633 = vmatpush3.bf16.msra.mxu0 %v896_v5 }
  0x50   :  { %634 = vmatprep.subr.bf16.mxu0 %v844_v0 }
  0x53   :  { %635 = vmatpush3.bf16.msra.mxu0 %v902_v6 }
  0x54   :  { %636 = vmatprep.subr.bf16.mxu0 %v844_v0 }
  0x57   :  { %637 = vmatpush3.bf16.msra.mxu0 %v908_v7 }
  0x58   :  { %638 = vmatprep.subr.bf16.mxu0 %v844_v0 }
  0x5b   :  { %639 = vmatpush3.bf16.msra.mxu0 %v914_v8 }
  0x5c   :  { %664 = vmatprep.subr.bf16.mxu0 %v844_v0 }
  0xfe   :  { %v147_v12 = vpop.f32.mrf.mxu0 }
  0xff   :  { %v156_v13 = vadd.f32 %v155_v11, %v147_v12 }
 0x100   :  { %v602_v14 = vpop.f32.mrf.mxu0 }
 0x101   :  { %760 = vtanh.f32 %v156_v13 }
 0x102   :  { %v150_v15 = vpop.f32.mrf.mxu0 }
 0x104   :  { %v603_v16 = vpop.f32.mrf.mxu0 }
 0x10e   :  { %v761_v17 = vpop.eup %760 }
 0x10f   :  { %v158_v18 = vpack.c.bf16 %v761_v17, %v761_v17 }
 0x111   :  { %621 = vmatmul.mubr.bf16.vlgmr.msra.gmra.mxu1 %v158_v18 }
 0x112   :  { %645 = vmatpush3.bf16.msra.mxu1 %v875_v1  ;;  %660 = vmatprep.mubr.msk.bf16.mxu1 %vm845_vm0, %v844_v0 }
 0x113   :  { %646 = vmatprep.subr.bf16.mxu1 %v844_v0 }
 0x116   :  { %647 = vmatpush3.bf16.msra.mxu1 %v878_v2 }
 0x117   :  { %648 = vmatprep.subr.bf16.mxu1 %v844_v0 }
 0x11a   :  { %649 = vmatpush3.bf16.msra.mxu1 %v884_v3 }
 0x11b   :  { %650 = vmatprep.subr.bf16.mxu1 %v844_v0 }
 0x11e   :  { %651 = vmatpush3.bf16.msra.mxu1 %v890_v4 }
 0x11f   :  { %652 = vmatprep.subr.bf16.mxu1 %v844_v0 }
 0x122   :  { %653 = vmatpush3.bf16.msra.mxu1 %v896_v5 }
 0x123   :  { %654 = vmatprep.subr.bf16.mxu1 %v844_v0 }
 0x126   :  { %655 = vmatpush3.bf16.msra.mxu1 %v902_v6 }
 0x127   :  { %656 = vmatprep.subr.bf16.mxu1 %v844_v0 }
 0x12a   :  { %657 = vmatpush3.bf16.msra.mxu1 %v908_v7 }
 0x12b   :  { %658 = vmatprep.subr.bf16.mxu1 %v844_v0 }
 0x12e   :  { %659 = vmatpush3.bf16.msra.mxu1 %v914_v8 }
 0x12f   :  { %684 = vmatprep.subr.bf16.mxu1 %v844_v0 }
 0x1d1   :  { %v193_v20 = vpop.f32.mrf.mxu1 }
 0x1d2   :  { %v199_v21 = vadd.f32 %v193_v20, %v156_v13 }
 0x1d3   :  { %v622_v22 = vpop.f32.mrf.mxu1 }
 0x1d4   :  { %v203_v23 = vadd.f32 %v202_v19, %v199_v21 }
 0x1d5   :  { %v196_v24 = vpop.f32.mrf.mxu1 }
 0x1d6   :  { %762 = vtanh.f32 %v203_v23 }
 0x1d7   :  { %v623_v25 = vpop.f32.mrf.mxu1 }
 0x1e3   :  { %v763_v26 = vpop.eup %762 }
 0x1e4   :  { %v205_v27 = vpack.c.bf16 %v763_v26, %v763_v26 }
 0x1e6   :  { %641 = vmatmul.mubr.bf16.vlgmr.msra.gmra.mxu0 %v205_v27 }
 0x1e7   :  { %665 = vmatpush3.bf16.msra.mxu0 %v875_v1  ;;  %680 = vmatprep.mubr.msk.bf16.mxu0 %vm845_vm0, %v844_v0 }
 0x1e8   :  { %666 = vmatprep.subr.bf16.mxu0 %v844_v0 }
 0x1eb   :  { %667 = vmatpush3.bf16.msra.mxu0 %v878_v2 }
 0x1ec   :  { %668 = vmatprep.subr.bf16.mxu0 %v844_v0 }
 0x1ef   :  { %669 = vmatpush3.bf16.msra.mxu0 %v884_v3 }
 0x1f0   :  { %670 = vmatprep.subr.bf16.mxu0 %v844_v0 }
 0x1f3   :  { %671 = vmatpush3.bf16.msra.mxu0 %v890_v4 }
 0x1f4   :  { %672 = vmatprep.subr.bf16.mxu0 %v844_v0 }
 0x1f7   :  { %673 = vmatpush3.bf16.msra.mxu0 %v896_v5 }
 0x1f8   :  { %674 = vmatprep.subr.bf16.mxu0 %v844_v0 }
 0x1fb   :  { %675 = vmatpush3.bf16.msra.mxu0 %v902_v6 }
 0x1fc   :  { %676 = vmatprep.subr.bf16.mxu0 %v844_v0 }
 0x1ff   :  { %677 = vmatpush3.bf16.msra.mxu0 %v908_v7 }
 0x200   :  { %678 = vmatprep.subr.bf16.mxu0 %v844_v0 }
 0x203   :  { %679 = vmatpush3.bf16.msra.mxu0 %v914_v8 }
 0x204   :  { %704 = vmatprep.subr.bf16.mxu0 %v844_v0 }
 0x2a6   :  { %v240_v30 = vpop.f32.mrf.mxu0 }
 0x2a7   :  { %v246_v31 = vadd.f32 %v240_v30, %v203_v23 }
 0x2a8   :  { %v642_v32 = vpop.f32.mrf.mxu0 }
 0x2a9   :  { %v250_v33 = vadd.f32 %v249_v29, %v246_v31 }
 0x2aa   :  { %v243_v34 = vpop.f32.mrf.mxu0 }
 0x2ab   :  { %764 = vtanh.f32 %v250_v33 }
 0x2ac   :  { %v643_v35 = vpop.f32.mrf.mxu0 }
 0x2b8   :  { %v765_v36 = vpop.eup %764 }
 0x2b9   :  { %v252_v37 = vpack.c.bf16 %v765_v36, %v765_v36 }
 0x2bb   :  { %661 = vmatmul.mubr.bf16.vlgmr.msra.gmra.mxu1 %v252_v37 }
 0x2bc   :  { %685 = vmatpush3.bf16.msra.mxu1 %v875_v1  ;;  %700 = vmatprep.mubr.msk.bf16.mxu1 %vm845_vm0, %v844_v0 }
 0x2bd   :  { %686 = vmatprep.subr.bf16.mxu1 %v844_v0 }
 0x2c0   :  { %687 = vmatpush3.bf16.msra.mxu1 %v878_v2 }
 0x2c1   :  { %688 = vmatprep.subr.bf16.mxu1 %v844_v0 }
 0x2c4   :  { %689 = vmatpush3.bf16.msra.mxu1 %v884_v3 }
 0x2c5   :  { %690 = vmatprep.subr.bf16.mxu1 %v844_v0 }
 0x2c8   :  { %691 = vmatpush3.bf16.msra.mxu1 %v890_v4 }
 0x2c9   :  { %692 = vmatprep.subr.bf16.mxu1 %v844_v0 }
 0x2cc   :  { %693 = vmatpush3.bf16.msra.mxu1 %v896_v5 }
 0x2cd   :  { %694 = vmatprep.subr.bf16.mxu1 %v844_v0 }
 0x2d0   :  { %695 = vmatpush3.bf16.msra.mxu1 %v902_v6 }
 0x2d1   :  { %696 = vmatprep.subr.bf16.mxu1 %v844_v0 }
 0x2d4   :  { %697 = vmatpush3.bf16.msra.mxu1 %v908_v7 }
 0x2d5   :  { %698 = vmatprep.subr.bf16.mxu1 %v844_v0 }
 0x2d8   :  { %699 = vmatpush3.bf16.msra.mxu1 %v914_v8 }
 0x2d9   :  { %724 = vmatprep.subr.bf16.mxu1 %v844_v0 }
 0x37b   :  { %v287_v39 = vpop.f32.mrf.mxu1 }
 0x37c   :  { %v293_v40 = vadd.f32 %v287_v39, %v250_v33 }
 0x37d   :  { %v662_v41 = vpop.f32.mrf.mxu1 }
 0x37e   :  { %v297_v42 = vadd.f32 %v296_v38, %v293_v40 }
 0x37f   :  { %v290_v43 = vpop.f32.mrf.mxu1 }
 0x380   :  { %766 = vtanh.f32 %v297_v42 }
 0x381   :  { %v663_v44 = vpop.f32.mrf.mxu1 }
 0x38d   :  { %v767_v45 = vpop.eup %766 }
 0x38e   :  { %v299_v46 = vpack.c.bf16 %v767_v45, %v767_v45 }
 0x390   :  { %681 = vmatmul.mubr.bf16.vlgmr.msra.gmra.mxu0 %v299_v46 }
 0x391   :  { %705 = vmatpush3.bf16.msra.mxu0 %v875_v1  ;;  %720 = vmatprep.mubr.msk.bf16.mxu0 %vm845_vm0, %v844_v0 }
 0x392   :  { %706 = vmatprep.subr.bf16.mxu0 %v844_v0 }
 0x395   :  { %707 = vmatpush3.bf16.msra.mxu0 %v878_v2 }
 0x396   :  { %708 = vmatprep.subr.bf16.mxu0 %v844_v0 }
 0x399   :  { %709 = vmatpush3.bf16.msra.mxu0 %v884_v3 }
 0x39a   :  { %710 = vmatprep.subr.bf16.mxu0 %v844_v0 }
 0x39d   :  { %711 = vmatpush3.bf16.msra.mxu0 %v890_v4 }
 0x39e   :  { %712 = vmatprep.subr.bf16.mxu0 %v844_v0 }
 0x3a1   :  { %713 = vmatpush3.bf16.msra.mxu0 %v896_v5 }
 0x3a2   :  { %714 = vmatprep.subr.bf16.mxu0 %v844_v0 }
 0x3a5   :  { %715 = vmatpush3.bf16.msra.mxu0 %v902_v6 }
 0x3a6   :  { %716 = vmatprep.subr.bf16.mxu0 %v844_v0 }
 0x3a9   :  { %717 = vmatpush3.bf16.msra.mxu0 %v908_v7 }
 0x3aa   :  { %718 = vmatprep.subr.bf16.mxu0 %v844_v0 }
 0x3ad   :  { %719 = vmatpush3.bf16.msra.mxu0 %v914_v8 }
 0x450   :  { %v334_v49 = vpop.f32.mrf.mxu0 }
 0x451   :  { %v340_v50 = vadd.f32 %v334_v49, %v297_v42 }
 0x452   :  { %v682_v51 = vpop.f32.mrf.mxu0 }
 0x453   :  { %v344_v52 = vadd.f32 %v343_v48, %v340_v50 }
 0x454   :  { %v337_v53 = vpop.f32.mrf.mxu0 }
 0x455   :  { %768 = vtanh.f32 %v344_v52 }
 0x456   :  { %v683_v54 = vpop.f32.mrf.mxu0 }
 0x462   :  { %v769_v55 = vpop.eup %768 }
 0x463   :  { %v346_v56 = vpack.c.bf16 %v769_v55, %v769_v55 }
 0x465   :  { %701 = vmatmul.mubr.bf16.vlgmr.msra.gmra.mxu1 %v346_v56 }
 0x466   :  { %725 = vmatpush3.bf16.msra.mxu1 %v875_v1  ;;  %740 = vmatprep.mubr.msk.bf16.mxu1 %vm845_vm0, %v844_v0 }
 0x467   :  { %726 = vmatprep.subr.bf16.mxu1 %v844_v0 }
 0x46a   :  { %727 = vmatpush3.bf16.msra.mxu1 %v878_v2 }
 0x46b   :  { %728 = vmatprep.subr.bf16.mxu1 %v844_v0 }
 0x46e   :  { %729 = vmatpush3.bf16.msra.mxu1 %v884_v3  ;;  %v436_v3 = vld [vmem:[#allocation3 + $0x18] sm:$0xff]  }
 0x46f   :  { %730 = vmatprep.subr.bf16.mxu1 %v844_v0  ;;  %v484_v12 = vunpack.c.h.bf16 %v436_v3 }
 0x472   :  { %731 = vmatpush3.bf16.msra.mxu1 %v890_v4  ;;  %v437_v4 = vunpack.c.l.bf16 %v436_v3 }
 0x473   :  { %732 = vmatprep.subr.bf16.mxu1 %v844_v0 }
 0x476   :  { %733 = vmatpush3.bf16.msra.mxu1 %v896_v5 }
 0x477   :  { %734 = vmatprep.subr.bf16.mxu1 %v844_v0 }
 0x47a   :  { %735 = vmatpush3.bf16.msra.mxu1 %v902_v6 }
 0x47b   :  { %736 = vmatprep.subr.bf16.mxu1 %v844_v0 }
 0x47e   :  { %737 = vmatpush3.bf16.msra.mxu1 %v908_v7 }
 0x47f   :  { %738 = vmatprep.subr.bf16.mxu1 %v844_v0 }
 0x482   :  { %739 = vmatpush3.bf16.msra.mxu1 %v914_v8 }
 0x525   :  { %v381_v58 = vpop.f32.mrf.mxu1 }
 0x526   :  { %v387_v59 = vadd.f32 %v381_v58, %v344_v52 }
 0x527   :  { %v702_v60 = vpop.f32.mrf.mxu1 }
 0x528   :  { %v391_v61 = vadd.f32 %v390_v57, %v387_v59 }
 0x529   :  { %v384_v62 = vpop.f32.mrf.mxu1 }
 0x52a   :  { %770 = vtanh.f32 %v391_v61 }
 0x52b   :  { %v703_v63 = vpop.f32.mrf.mxu1 }
 0x537   :  { %v771_v1 = vpop.eup %770 }
 0x538   :  { %v393_v2 = vpack.c.bf16 %v771_v1, %v771_v1 }
 0x53a   :  { %721 = vmatmul.mubr.bf16.vlgmr.msra.gmra.mxu0 %v393_v2 }
 0x5fa   :  { %v428_v5 = vpop.f32.mrf.mxu0 }
 0x5fb   :  { %v434_v6 = vadd.f32 %v428_v5, %v391_v61 }
 0x5fc   :  { %v722_v7 = vpop.f32.mrf.mxu0 }
 0x5fd   :  { %v438_v9 = vadd.f32 %v437_v4, %v434_v6 }
 0x5fe   :  { %v431_v0 = vpop.f32.mrf.mxu0 }
 0x5ff   :  { %772 = vtanh.f32 %v438_v9 }
 0x600   :  { %v723_v8 = vpop.f32.mrf.mxu0 }
 0x60c   :  { %v773_v10 = vpop.eup %772 }
 0x60d   :  { %v440_v11 = vpack.c.bf16 %v773_v10, %v773_v10 }
 0x60f   :  { %741 = vmatmul.mubr.bf16.vlgmr.msra.gmra.mxu1 %v440_v11 }
 0x6cf   :  { %v475_v13 = vpop.f32.mrf.mxu1 }
 0x6d0   :  { %v481_v14 = vadd.f32 %v475_v13, %v438_v9 }
 0x6d1   :  { %v742_v15 = vpop.f32.mrf.mxu1 }
 0x6d2   :  { %v485_v16 = vadd.f32 %v484_v12, %v481_v14 }
 0x6d3   :  { %v478_v17 = vpop.f32.mrf.mxu1 }
 0x6d4   :  { %487 = vst [vmem:[#allocation8] sm:$0xff] %v485_v16 }
 0x6d5   :  { %v743_v18 = vpop.f32.mrf.mxu1 }
 0x6d6   :  { %825 = shalt.err (!%p822_p0)
}
 0x6d7   :  { %497 = dma.vmem_to_hbm [thread:$0]  %s495_s1, 128, %s1034_s2, [#allocation5]  }
 0x6d8   :  { %838 = dma.done.wait [#allocation5], 128  }
 0x6d9   :  { %839 = vsyncadd [#allocation5], 4294967168 }
 0x6da   :  { %501 = vsyncpa [#allocation4], 1 }
 0x6db   :  { %502 = vsyncpa [#allocation7], 1 }
 0x6dc   :  { %503 = vsyncpa [#allocation5], 1 }

// kernel: tpu_custom_call.1
= control target key start
LH: loop header
LB: loop body
LE: loop exit
PB: predicated region body
PF: predicated region fallthrough
CT: control target
= control target key end

     0   :  { %7 = vsyncpa [#allocation4], 0  ;;  %s1032_s0 = inlined_call_operand.hbm [shape: bf16[8,8,128], index: 0, kind: input, shape index: {}]   ;;  %s1033_s1 = inlined_call_operand.hbm [shape: bf16[128,128], index: 1, kind: input, shape index: {}]   ;;  %s1034_s2 = inlined_call_operand.hbm [shape: f32[8,128], index: 2, kind: output, shape index: {}]  }
   0x1   :  { %8 = vsyncpa [#allocation7], 0 }
   0x2   :  { %9 = vsyncpa [#allocation5], 0  ;;  %s840_s9 = smov [#allocation3]  }
   0x3   :  { %s15_s10 = sshll.u32 %s840_s9, 4  ;;  %s16_s10 = int_to_ptr.vmem [resolvable:$true] %s15_s10 }
   0x4   :  { %s782_s11 = scalar_lea.vmem %s16_s10, 512  ;;  %p787_p1 = scmp.lt.s32.totalorder %s16_s10, %s16_s10 }
   0x5   :  { %p783_p0 = scmp.ne.s32.totalorder %s16_s10, %s782_s11  ;;  %p788_p2 = scmp.lt.s32.totalorder %s782_s11, %s782_s11 }
   0x7   :  { %p789_p3 = por %p788_p2, %p787_p1 }
   0x9   :  { %p790_p4 = pnand %p789_p3, %p783_p0 }
   0xb   :  { %793 = shalt.err (!%p790_p4)
}
   0xc   :  { %s841_s12 = smov 64   ;;  %s842_s13 = smov 4  }
   0xd   :  { %21 = dma.hbm_to_vmem [thread:$0]  %s1032_s0, 512, %s16_s10, [#allocation4], %s841_s12, %s841_s12, %s842_s13  }
   0xe   :  { %s843_s16 = smov [#allocation6]  }
   0xf   :  { %s27_s17 = sshll.u32 %s843_s16, 4  ;;  %s28_s17 = int_to_ptr.vmem [resolvable:$true] %s27_s17 }
  0x10   :  { %s802_s18 = scalar_lea.vmem %s28_s17, 1024  ;;  %p807_p6 = scmp.lt.s32.totalorder %s28_s17, %s28_s17 }
  0x11   :  { %p803_p5 = scmp.ne.s32.totalorder %s28_s17, %s802_s18  ;;  %p808_p7 = scmp.lt.s32.totalorder %s802_s18, %s802_s18 }
  0x13   :  { %p809_p8 = por %p808_p7, %p807_p6 }
  0x15   :  { %p810_p9 = pnand %p809_p8, %p803_p5 }
  0x17   :  { %813 = shalt.err (!%p810_p9)
}
  0x18   :  { %33 = dma.hbm_to_vmem [thread:$0]  %s1033_s1, 1024, %s28_s17, [#allocation7], %s841_s12, %s841_s12, %s842_s13  }
  0x19   :  { %834 = dma.done.wait [#allocation4], 512  }
  0x1a   :  { %835 = vsyncadd [#allocation4], 4294966784 }
  0x1b   :  { %836 = dma.done.wait [#allocation7], 1024  }
  0x1c   :  { %837 = vsyncadd [#allocation7], 4294966272  ;;  %v844_v0 = vmov 0.0   ;;  %vm845_vm0 = vmmov 0   ;;  %v875_v1 = vld [vmem:[#allocation6 + $0x38] sm:$0xff]   ;;  %v878_v2 = vld [vmem:[#allocation6 + $0x30] sm:$0xff]  }
  0x1d   :  { %584 = vmatprep.subr.bf16.mxu0 %v844_v0  ;;  %600 = vmatprep.mubr.msk.bf16.mxu0 %vm845_vm0, %v844_v0  ;;  %v884_v3 = vld [vmem:[#allocation6 + $0x28] sm:$0xff]   ;;  %v890_v4 = vld [vmem:[#allocation6 + $0x20] sm:$0xff]   ;;  %v896_v5 = vld [vmem:[#allocation6 + $0x18] sm:$0xff]   ;;  %v846_v9 = vmov 0.0|0.0   ;;  %s847_s0 = smov [#allocation8]  }
  0x1e   :  { %604 = vmatprep.subr.bf16.mxu1 %v844_v0  ;;  %620 = vmatprep.mubr.msk.bf16.mxu1 %vm845_vm0, %v844_v0  ;;  %v902_v6 = vld [vmem:[#allocation6 + $0x10] sm:$0xff]   ;;  %v908_v7 = vld [vmem:[#allocation6 + $0x8] sm:$0xff]   ;;  %v914_v8 = vld [vmem:[#allocation6] sm:$0xff]   ;;  %s494_s1 = sshll.u32 %s847_s0, 4  ;;  %s495_s1 = int_to_ptr.vmem [resolvable:$true] %s494_s1 }
  0x1f   :  { %585 = vmatpush3.bf16.msra.mxu0 %v875_v1  ;;  %605 = vmatpush3.bf16.msra.mxu1 %v875_v1  ;;  %v154_v10 = vld [vmem:[#allocation3] sm:$0xff]   ;;  %v248_v28 = vld [vmem:[#allocation3 + $0x8] sm:$0xff]   ;;  %v342_v47 = vld [vmem:[#allocation3 + $0x10] sm:$0xff]   ;;  %s814_s21 = scalar_lea.vmem %s495_s1, 128  ;;  %p819_p11 = scmp.lt.s32.totalorder %s495_s1, %s495_s1 }
  0x20   :  { %586 = vmatprep.subr.bf16.mxu0 %v844_v0  ;;  %606 = vmatprep.subr.bf16.mxu1 %v844_v0  ;;  %v155_v11 = vunpack.c.l.bf16 %v154_v10  ;;  %v202_v19 = vunpack.c.h.bf16 %v154_v10  ;;  %v249_v29 = vunpack.c.l.bf16 %v248_v28  ;;  %v296_v38 = vunpack.c.h.bf16 %v248_v28  ;;  %p815_p10 = scmp.ne.s32.totalorder %s495_s1, %s814_s21  ;;  %p820_p12 = scmp.lt.s32.totalorder %s814_s21, %s814_s21 }
  0x21   :  { %v343_v48 = vunpack.c.l.bf16 %v342_v47  ;;  %v390_v57 = vunpack.c.h.bf16 %v342_v47 }
  0x22   :  { %p821_p13 = por %p820_p12, %p819_p11 }
  0x23   :  { %587 = vmatpush3.bf16.msra.mxu0 %v878_v2  ;;  %607 = vmatpush3.bf16.msra.mxu1 %v878_v2 }
  0x24   :  { %588 = vmatprep.subr.bf16.mxu0 %v844_v0  ;;  %608 = vmatprep.subr.bf16.mxu1 %v844_v0  ;;  %p822_p0 = pnand %p821_p13, %p815_p10 }
  0x27   :  { %589 = vmatpush3.bf16.msra.mxu0 %v884_v3  ;;  %609 = vmatpush3.bf16.msra.mxu1 %v884_v3 }
  0x28   :  { %590 = vmatprep.subr.bf16.mxu0 %v844_v0  ;;  %610 = vmatprep.subr.bf16.mxu1 %v844_v0 }
  0x2b   :  { %591 = vmatpush3.bf16.msra.mxu0 %v890_v4  ;;  %611 = vmatpush3.bf16.msra.mxu1 %v890_v4 }
  0x2c   :  { %592 = vmatprep.subr.bf16.mxu0 %v844_v0  ;;  %612 = vmatprep.subr.bf16.mxu1 %v844_v0 }
  0x2f   :  { %593 = vmatpush3.bf16.msra.mxu0 %v896_v5  ;;  %613 = vmatpush3.bf16.msra.mxu1 %v896_v5 }
  0x30   :  { %594 = vmatprep.subr.bf16.mxu0 %v844_v0  ;;  %614 = vmatprep.subr.bf16.mxu1 %v844_v0 }
  0x33   :  { %595 = vmatpush3.bf16.msra.mxu0 %v902_v6  ;;  %615 = vmatpush3.bf16.msra.mxu1 %v902_v6 }
  0x34   :  { %596 = vmatprep.subr.bf16.mxu0 %v844_v0  ;;  %616 = vmatprep.subr.bf16.mxu1 %v844_v0 }
  0x37   :  { %597 = vmatpush3.bf16.msra.mxu0 %v908_v7  ;;  %617 = vmatpush3.bf16.msra.mxu1 %v908_v7 }
  0x38   :  { %598 = vmatprep.subr.bf16.mxu0 %v844_v0  ;;  %618 = vmatprep.subr.bf16.mxu1 %v844_v0 }
  0x3b   :  { %599 = vmatpush3.bf16.msra.mxu0 %v914_v8  ;;  %619 = vmatpush3.bf16.msra.mxu1 %v914_v8 }
  0x3c   :  { %624 = vmatprep.subr.bf16.mxu0 %v844_v0  ;;  %644 = vmatprep.subr.bf16.mxu1 %v844_v0 }
  0x3e   :  { %601 = vmatmul.mubr.bf16.vlgmr.msra.gmra.mxu0 %v846_v9 }
  0x3f   :  { %625 = vmatpush3.bf16.msra.mxu0 %v875_v1  ;;  %640 = vmatprep.mubr.msk.bf16.mxu0 %vm845_vm0, %v844_v0 }
  0x40   :  { %626 = vmatprep.subr.bf16.mxu0 %v844_v0 }
  0x43   :  { %627 = vmatpush3.bf16.msra.mxu0 %v878_v2 }
  0x44   :  { %628 = vmatprep.subr.bf16.mxu0 %v844_v0 }
  0x47   :  { %629 = vmatpush3.bf16.msra.mxu0 %v884_v3 }
  0x48   :  { %630 = vmatprep.subr.bf16.mxu0 %v844_v0 }
  0x4b   :  { %631 = vmatpush3.bf16.msra.mxu0 %v890_v4 }
  0x4c   :  { %632 = vmatprep.subr.bf16.mxu0 %v844_v0 }
  0x4f   :  { %633 = vmatpush3.bf16.msra.mxu0 %v896_v5 }
  0x50   :  { %634 = vmatprep.subr.bf16.mxu0 %v844_v0 }
  0x53   :  { %635 = vmatpush3.bf16.msra.mxu0 %v902_v6 }
  0x54   :  { %636 = vmatprep.subr.bf16.mxu0 %v844_v0 }
  0x57   :  { %637 = vmatpush3.bf16.msra.mxu0 %v908_v7 }
  0x58   :  { %638 = vmatprep.subr.bf16.mxu0 %v844_v0 }
  0x5b   :  { %639 = vmatpush3.bf16.msra.mxu0 %v914_v8 }
  0x5c   :  { %664 = vmatprep.subr.bf16.mxu0 %v844_v0 }
  0xfe   :  { %v147_v12 = vpop.f32.mrf.mxu0 }
  0xff   :  { %v156_v13 = vadd.f32 %v155_v11, %v147_v12 }
 0x100   :  { %v602_v14 = vpop.f32.mrf.mxu0 }
 0x101   :  { %760 = vtanh.f32 %v156_v13 }
 0x102   :  { %v150_v15 = vpop.f32.mrf.mxu0 }
 0x104   :  { %v603_v16 = vpop.f32.mrf.mxu0 }
 0x10e   :  { %v761_v17 = vpop.eup %760 }
 0x10f   :  { %v158_v18 = vpack.c.bf16 %v761_v17, %v761_v17 }
 0x111   :  { %621 = vmatmul.mubr.bf16.vlgmr.msra.gmra.mxu1 %v158_v18 }
 0x112   :  { %645 = vmatpush3.bf16.msra.mxu1 %v875_v1  ;;  %660 = vmatprep.mubr.msk.bf16.mxu1 %vm845_vm0, %v844_v0 }
 0x113   :  { %646 = vmatprep.subr.bf16.mxu1 %v844_v0 }
 0x116   :  { %647 = vmatpush3.bf16.msra.mxu1 %v878_v2 }
 0x117   :  { %648 = vmatprep.subr.bf16.mxu1 %v844_v0 }
 0x11a   :  { %649 = vmatpush3.bf16.msra.mxu1 %v884_v3 }
 0x11b   :  { %650 = vmatprep.subr.bf16.mxu1 %v844_v0 }
 0x11e   :  { %651 = vmatpush3.bf16.msra.mxu1 %v890_v4 }
 0x11f   :  { %652 = vmatprep.subr.bf16.mxu1 %v844_v0 }
 0x122   :  { %653 = vmatpush3.bf16.msra.mxu1 %v896_v5 }
 0x123   :  { %654 = vmatprep.subr.bf16.mxu1 %v844_v0 }
 0x126   :  { %655 = vmatpush3.bf16.msra.mxu1 %v902_v6 }
 0x127   :  { %656 = vmatprep.subr.bf16.mxu1 %v844_v0 }
 0x12a   :  { %657 = vmatpush3.bf16.msra.mxu1 %v908_v7 }
 0x12b   :  { %658 = vmatprep.subr.bf16.mxu1 %v844_v0 }
 0x12e   :  { %659 = vmatpush3.bf16.msra.mxu1 %v914_v8 }
 0x12f   :  { %684 = vmatprep.subr.bf16.mxu1 %v844_v0 }
 0x1d1   :  { %v193_v20 = vpop.f32.mrf.mxu1 }
 0x1d2   :  { %v199_v21 = vadd.f32 %v193_v20, %v156_v13 }
 0x1d3   :  { %v622_v22 = vpop.f32.mrf.mxu1 }
 0x1d4   :  { %v203_v23 = vadd.f32 %v202_v19, %v199_v21 }
 0x1d5   :  { %v196_v24 = vpop.f32.mrf.mxu1 }
 0x1d6   :  { %762 = vtanh.f32 %v203_v23 }
 0x1d7   :  { %v623_v25 = vpop.f32.mrf.mxu1 }
 0x1e3   :  { %v763_v26 = vpop.eup %762 }
 0x1e4   :  { %v205_v27 = vpack.c.bf16 %v763_v26, %v763_v26 }
 0x1e6   :  { %641 = vmatmul.mubr.bf16.vlgmr.msra.gmra.mxu0 %v205_v27 }
 0x1e7   :  { %665 = vmatpush3.bf16.msra.mxu0 %v875_v1  ;;  %680 = vmatprep.mubr.msk.bf16.mxu0 %vm845_vm0, %v844_v0 }
 0x1e8   :  { %666 = vmatprep.subr.bf16.mxu0 %v844_v0 }
 0x1eb   :  { %667 = vmatpush3.bf16.msra.mxu0 %v878_v2 }
 0x1ec   :  { %668 = vmatprep.subr.bf16.mxu0 %v844_v0 }
 0x1ef   :  { %669 = vmatpush3.bf16.msra.mxu0 %v884_v3 }
 0x1f0   :  { %670 = vmatprep.subr.bf16.mxu0 %v844_v0 }
 0x1f3   :  { %671 = vmatpush3.bf16.msra.mxu0 %v890_v4 }
 0x1f4   :  { %672 = vmatprep.subr.bf16.mxu0 %v844_v0 }
 0x1f7   :  { %673 = vmatpush3.bf16.msra.mxu0 %v896_v5 }
 0x1f8   :  { %674 = vmatprep.subr.bf16.mxu0 %v844_v0 }
 0x1fb   :  { %675 = vmatpush3.bf16.msra.mxu0 %v902_v6 }
 0x1fc   :  { %676 = vmatprep.subr.bf16.mxu0 %v844_v0 }
 0x1ff   :  { %677 = vmatpush3.bf16.msra.mxu0 %v908_v7 }
 0x200   :  { %678 = vmatprep.subr.bf16.mxu0 %v844_v0 }
 0x203   :  { %679 = vmatpush3.bf16.msra.mxu0 %v914_v8 }
 0x204   :  { %704 = vmatprep.subr.bf16.mxu0 %v844_v0 }
 0x2a6   :  { %v240_v30 = vpop.f32.mrf.mxu0 }
 0x2a7   :  { %v246_v31 = vadd.f32 %v240_v30, %v203_v23 }
 0x2a8   :  { %v642_v32 = vpop.f32.mrf.mxu0 }
 0x2a9   :  { %v250_v33 = vadd.f32 %v249_v29, %v246_v31 }
 0x2aa   :  { %v243_v34 = vpop.f32.mrf.mxu0 }
 0x2ab   :  { %764 = vtanh.f32 %v250_v33 }
 0x2ac   :  { %v643_v35 = vpop.f32.mrf.mxu0 }
 0x2b8   :  { %v765_v36 = vpop.eup %764 }
 0x2b9   :  { %v252_v37 = vpack.c.bf16 %v765_v36, %v765_v36 }
 0x2bb   :  { %661 = vmatmul.mubr.bf16.vlgmr.msra.gmra.mxu1 %v252_v37 }
 0x2bc   :  { %685 = vmatpush3.bf16.msra.mxu1 %v875_v1  ;;  %700 = vmatprep.mubr.msk.bf16.mxu1 %vm845_vm0, %v844_v0 }
 0x2bd   :  { %686 = vmatprep.subr.bf16.mxu1 %v844_v0 }
 0x2c0   :  { %687 = vmatpush3.bf16.msra.mxu1 %v878_v2 }
 0x2c1   :  { %688 = vmatprep.subr.bf16.mxu1 %v844_v0 }
 0x2c4   :  { %689 = vmatpush3.bf16.msra.mxu1 %v884_v3 }
 0x2c5   :  { %690 = vmatprep.subr.bf16.mxu1 %v844_v0 }
 0x2c8   :  { %691 = vmatpush3.bf16.msra.mxu1 %v890_v4 }
 0x2c9   :  { %692 = vmatprep.subr.bf16.mxu1 %v844_v0 }
 0x2cc   :  { %693 = vmatpush3.bf16.msra.mxu1 %v896_v5 }
 0x2cd   :  { %694 = vmatprep.subr.bf16.mxu1 %v844_v0 }
 0x2d0   :  { %695 = vmatpush3.bf16.msra.mxu1 %v902_v6 }
 0x2d1   :  { %696 = vmatprep.subr.bf16.mxu1 %v844_v0 }
 0x2d4   :  { %697 = vmatpush3.bf16.msra.mxu1 %v908_v7 }
 0x2d5   :  { %698 = vmatprep.subr.bf16.mxu1 %v844_v0 }
 0x2d8   :  { %699 = vmatpush3.bf16.msra.mxu1 %v914_v8 }
 0x2d9   :  { %724 = vmatprep.subr.bf16.mxu1 %v844_v0 }
 0x37b   :  { %v287_v39 = vpop.f32.mrf.mxu1 }
 0x37c   :  { %v293_v40 = vadd.f32 %v287_v39, %v250_v33 }
 0x37d   :  { %v662_v41 = vpop.f32.mrf.mxu1 }
 0x37e   :  { %v297_v42 = vadd.f32 %v296_v38, %v293_v40 }
 0x37f   :  { %v290_v43 = vpop.f32.mrf.mxu1 }
 0x380   :  { %766 = vtanh.f32 %v297_v42 }
 0x381   :  { %v663_v44 = vpop.f32.mrf.mxu1 }
 0x38d   :  { %v767_v45 = vpop.eup %766 }
 0x38e   :  { %v299_v46 = vpack.c.bf16 %v767_v45, %v767_v45 }
 0x390   :  { %681 = vmatmul.mubr.bf16.vlgmr.msra.gmra.mxu0 %v299_v46 }
 0x391   :  { %705 = vmatpush3.bf16.msra.mxu0 %v875_v1  ;;  %720 = vmatprep.mubr.msk.bf16.mxu0 %vm845_vm0, %v844_v0 }
 0x392   :  { %706 = vmatprep.subr.bf16.mxu0 %v844_v0 }
 0x395   :  { %707 = vmatpush3.bf16.msra.mxu0 %v878_v2 }
 0x396   :  { %708 = vmatprep.subr.bf16.mxu0 %v844_v0 }
 0x399   :  { %709 = vmatpush3.bf16.msra.mxu0 %v884_v3 }
 0x39a   :  { %710 = vmatprep.subr.bf16.mxu0 %v844_v0 }
 0x39d   :  { %711 = vmatpush3.bf16.msra.mxu0 %v890_v4 }
 0x39e   :  { %712 = vmatprep.subr.bf16.mxu0 %v844_v0 }
 0x3a1   :  { %713 = vmatpush3.bf16.msra.mxu0 %v896_v5 }
 0x3a2   :  { %714 = vmatprep.subr.bf16.mxu0 %v844_v0 }
 0x3a5   :  { %715 = vmatpush3.bf16.msra.mxu0 %v902_v6 }
 0x3a6   :  { %716 = vmatprep.subr.bf16.mxu0 %v844_v0 }
 0x3a9   :  { %717 = vmatpush3.bf16.msra.mxu0 %v908_v7 }
 0x3aa   :  { %718 = vmatprep.subr.bf16.mxu0 %v844_v0 }
 0x3ad   :  { %719 = vmatpush3.bf16.msra.mxu0 %v914_v8 }
 0x450   :  { %v334_v49 = vpop.f32.mrf.mxu0 }
 0x451   :  { %v340_v50 = vadd.f32 %v334_v49, %v297_v42 }
 0x452   :  { %v682_v51 = vpop.f32.mrf.mxu0 }
 0x453   :  { %v344_v52 = vadd.f32 %v343_v48, %v340_v50 }
 0x454   :  { %v337_v53 = vpop.f32.mrf.mxu0 }
 0x455   :  { %768 = vtanh.f32 %v344_v52 }
 0x456   :  { %v683_v54 = vpop.f32.mrf.mxu0 }
 0x462   :  { %v769_v55 = vpop.eup %768 }
 0x463   :  { %v346_v56 = vpack.c.bf16 %v769_v55, %v769_v55 }
 0x465   :  { %701 = vmatmul.mubr.bf16.vlgmr.msra.gmra.mxu1 %v346_v56 }
 0x466   :  { %725 = vmatpush3.bf16.msra.mxu1 %v875_v1  ;;  %740 = vmatprep.mubr.msk.bf16.mxu1 %vm845_vm0, %v844_v0 }
 0x467   :  { %726 = vmatprep.subr.bf16.mxu1 %v844_v0 }
 0x46a   :  { %727 = vmatpush3.bf16.msra.mxu1 %v878_v2 }
 0x46b   :  { %728 = vmatprep.subr.bf16.mxu1 %v844_v0 }
 0x46e   :  { %729 = vmatpush3.bf16.msra.mxu1 %v884_v3  ;;  %v436_v3 = vld [vmem:[#allocation3 + $0x18] sm:$0xff]  }
 0x46f   :  { %730 = vmatprep.subr.bf16.mxu1 %v844_v0  ;;  %v484_v12 = vunpack.c.h.bf16 %v436_v3 }
 0x472   :  { %731 = vmatpush3.bf16.msra.mxu1 %v890_v4  ;;  %v437_v4 = vunpack.c.l.bf16 %v436_v3 }
 0x473   :  { %732 = vmatprep.subr.bf16.mxu1 %v844_v0 }
 0x476   :  { %733 = vmatpush3.bf16.msra.mxu1 %v896_v5 }
 0x477   :  { %734 = vmatprep.subr.bf16.mxu1 %v844_v0 }
 0x47a   :  { %735 = vmatpush3.bf16.msra.mxu1 %v902_v6 }
 0x47b   :  { %736 = vmatprep.subr.bf16.mxu1 %v844_v0 }
 0x47e   :  { %737 = vmatpush3.bf16.msra.mxu1 %v908_v7 }
 0x47f   :  { %738 = vmatprep.subr.bf16.mxu1 %v844_v0 }
 0x482   :  { %739 = vmatpush3.bf16.msra.mxu1 %v914_v8 }
 0x525   :  { %v381_v58 = vpop.f32.mrf.mxu1 }
 0x526   :  { %v387_v59 = vadd.f32 %v381_v58, %v344_v52 }
 0x527   :  { %v702_v60 = vpop.f32.mrf.mxu1 }
 0x528   :  { %v391_v61 = vadd.f32 %v390_v57, %v387_v59 }
 0x529   :  { %v384_v62 = vpop.f32.mrf.mxu1 }
 0x52a   :  { %770 = vtanh.f32 %v391_v61 }
 0x52b   :  { %v703_v63 = vpop.f32.mrf.mxu1 }
 0x537   :  { %v771_v1 = vpop.eup %770 }
 0x538   :  { %v393_v2 = vpack.c.bf16 %v771_v1, %v771_v1 }
 0x53a   :  { %721 = vmatmul.mubr.bf16.vlgmr.msra.gmra.mxu0 %v393_v2 }
 0x5fa   :  { %v428_v5 = vpop.f32.mrf.mxu0 }
 0x5fb   :  { %v434_v6 = vadd.f32 %v428_v5, %v391_v61 }
 0x5fc   :  { %v722_v7 = vpop.f32.mrf.mxu0 }
 0x5fd   :  { %v438_v9 = vadd.f32 %v437_v4, %v434_v6 }
 0x5fe   :  { %v431_v0 = vpop.f32.mrf.mxu0 }
 0x5ff   :  { %772 = vtanh.f32 %v438_v9 }
 0x600   :  { %v723_v8 = vpop.f32.mrf.mxu0 }
 0x60c   :  { %v773_v10 = vpop.eup %772 }
 0x60d   :  { %v440_v11 = vpack.c.bf16 %v773_v10, %v773_v10 }
 0x60f   :  { %741 = vmatmul.mubr.bf16.vlgmr.msra.gmra.mxu1 %v440_v11 }
 0x6cf   :  { %v475_v13 = vpop.f32.mrf.mxu1 }
 0x6d0   :  { %v481_v14 = vadd.f32 %v475_v13, %v438_v9 }
 0x6d1   :  { %v742_v15 = vpop.f32.mrf.mxu1 }
 0x6d2   :  { %v485_v16 = vadd.f32 %v484_v12, %v481_v14 }
 0x6d3   :  { %v478_v17 = vpop.f32.mrf.mxu1 }
 0x6d4   :  { %487 = vst [vmem:[#allocation8] sm:$0xff] %v485_v16 }
 0x6d5   :  { %v743_v18 = vpop.f32.mrf.mxu1 }
 0x6d6   :  { %825 = shalt.err (!%p822_p0)
}
 0x6d7   :  { %497 = dma.vmem_to_hbm [thread:$0]  %s495_s1, 128, %s1034_s2, [#allocation5]  }
 0x6d8   :  { %838 = dma.done.wait [#allocation5], 128  }
 0x6d9   :  { %839 = vsyncadd [#allocation5], 4294967168 }
 0x6da   :  { %501 = vsyncpa [#allocation4], 1 }
 0x6db   :  { %502 = vsyncpa [#allocation7], 1 }
 0x6dc   :  { %503 = vsyncpa [#allocation5], 1 }

</bundles_post_ra>
